<compile_context>
chip_gen: v7x
topology: tpu7x:2x2x1
jax: 0.10.0
libtpu: 0.0.40
codegen_flags: <defaults>
</compile_context>

<pallas_src>
import functools

import jax
import jax.numpy as jnp
from jax.experimental import pallas as pl
from jax.experimental.pallas import tpu as pltpu

SMOOTH = 1.0
LANE = 128
MAX_TILE_HW = 1024   # lanes per HW tile; sized well under v7x's 64 MiB VMEM


def _round_up(x, m):
    return ((x + m - 1) // m) * m


def _dice_kernel(x_ref, y_ref, out_ref, acc_xy, acc_x, acc_y, *, n_chunks):
    """x_ref, y_ref: (C_BLK, TILE_HW) tiles (native dtype); out_ref: (C_BLK, 128)
    per-class dice (broadcast across lanes); acc_*: (C_BLK, 128) f32 scratch."""
    t = pl.program_id(1)

    @pl.when(t == 0)
    def _():
        acc_xy[...] = jnp.zeros_like(acc_xy)
        acc_x[...] = jnp.zeros_like(acc_x)
        acc_y[...] = jnp.zeros_like(acc_y)

    # Streaming loop: lane-parallel partial sums (pure VPU adds, per-chunk
    # loads keep register pressure low). The cross-lane reduce is deferred.
    for k in range(n_chunks):
        xs = x_ref[:, k * LANE:(k + 1) * LANE].astype(jnp.float32)
        ys = y_ref[:, k * LANE:(k + 1) * LANE].astype(jnp.float32)
        acc_xy[...] += xs * ys
        acc_x[...] += xs
        acc_y[...] += ys

    @pl.when(t == pl.num_programs(1) - 1)
    def _():
        inter = jnp.sum(acc_xy[...], axis=1, keepdims=True)   # (C_BLK, 1)
        sx = jnp.sum(acc_x[...], axis=1, keepdims=True)
        sy = jnp.sum(acc_y[...], axis=1, keepdims=True)
        dice = (2.0 * inter + SMOOTH) / (sx + sy + SMOOTH)
        out_ref[...] = jnp.broadcast_to(dice, out_ref.shape)


@functools.partial(jax.jit, static_argnames=("num_classes",))
def custom_dice(x, y, num_classes):
    """x, y: (C, H, W) (any float dtype); num_classes: static tuple of class indices."""
    C = x.shape[0]
    hw = 1
    for d in x.shape[1:]:
        hw *= d
    x2 = x.reshape(C, hw)
    y2 = y.reshape(C, hw)

    # --- HW-axis tiling (lane axis). Pad with zeros: zeros contribute nothing
    # to Σxy / Σx / Σy, so the dice is unchanged.
    if hw <= MAX_TILE_HW:
        tile_hw = _round_up(hw, LANE)
        hw_pad = tile_hw
    else:
        tile_hw = MAX_TILE_HW
        hw_pad = _round_up(hw, tile_hw)
    if hw_pad != hw:
        pad = hw_pad - hw
        x2 = jnp.pad(x2, ((0, 0), (0, pad)))
        y2 = jnp.pad(y2, ((0, 0), (0, pad)))

    # --- class-axis blocking: blocks of 8 (full f32 sublane groups) when they
    # divide C (enables megacore 'parallel' sharding on v7x); otherwise the
    # full class dim in one block (allowed since it equals the array dim).
    c_blk = 8 if (C % 8 == 0) else C
    n_cblk = C // c_blk
    n_t = hw_pad // tile_hw
    n_chunks = tile_hw // LANE

    kernel = functools.partial(_dice_kernel, n_chunks=n_chunks)
    itemsize = jnp.dtype(x2.dtype).itemsize

    out = pl.pallas_call(
        kernel,
        out_shape=jax.ShapeDtypeStruct((C, LANE), jnp.float32),
        grid_spec=pltpu.PrefetchScalarGridSpec(
            num_scalar_prefetch=0,
            grid=(n_cblk, n_t),
            in_specs=[
                pl.BlockSpec((c_blk, tile_hw), lambda c, t: (c, t)),
                pl.BlockSpec((c_blk, tile_hw), lambda c, t: (c, t)),
            ],
            out_specs=pl.BlockSpec((c_blk, LANE), lambda c, t: (c, 0)),
            scratch_shapes=[pltpu.VMEM((c_blk, LANE), jnp.float32)] * 3,
        ),
        compiler_params=pltpu.CompilerParams(
            dimension_semantics=("parallel", "arbitrary")),
        cost_estimate=pl.CostEstimate(
            flops=4 * C * hw_pad,
            transcendentals=0,
            bytes_accessed=2 * C * hw_pad * itemsize + C * LANE * 4),
    )(x2, y2)

    dice_per_class = out[:, 0]                       # (C,)

    # Class weights: counts handle duplicate indices exactly like the
    # reference loop (each occurrence contributes once to the sum).
    w = [0.0] * C
    for i in num_classes:
        w[i] += 1.0
    weights = jnp.asarray(w, jnp.float32) / float(len(num_classes))
    return jnp.sum(dice_per_class * weights)


def _reference(x, y, num_classes):
    """Pure-JAX reference of the PyTorch forward."""
    total = 0.0
    for i in num_classes:
        xi = x[i].reshape(-1).astype(jnp.float32)
        yi = y[i].reshape(-1).astype(jnp.float32)
        inter = jnp.sum(xi * yi)
        dice = (2.0 * inter + SMOOTH) / (jnp.sum(xi) + jnp.sum(yi) + SMOOTH)
        total = total + dice
    return total / len(num_classes)


if __name__ == "__main__":
    key = jax.random.PRNGKey(0)

    # Primary small case matching the module's per-class layout.
    k1, k2, k3, k4 = jax.random.split(key, 4)
    C, H, W = 4, 16, 16
    num_classes = (0, 1, 2, 3)
    x = jax.random.uniform(k1, (C, H, W), dtype=jnp.float32)
    y = jax.random.bernoulli(k2, 0.5, (C, H, W)).astype(jnp.float32)

    out = custom_dice(x, y, num_classes)
    out = jax.block_until_ready(out)
    ref = _reference(x, y, num_classes)
    assert jnp.allclose(out, ref, rtol=1e-4, atol=1e-5), (out, ref)

    # Second case exercising the multi-tile (HW-streaming) accumulation path
    # and the 8-class sublane-full block.
    C2, H2, W2 = 8, 64, 64
    num_classes2 = (0, 1, 2, 3, 4, 5, 6, 7)
    x2 = jax.random.uniform(k3, (C2, H2, W2), dtype=jnp.float32)
    y2 = jax.random.bernoulli(k4, 0.5, (C2, H2, W2)).astype(jnp.float32)

    out2 = custom_dice(x2, y2, num_classes2)
    out2 = jax.block_until_ready(out2)
    ref2 = _reference(x2, y2, num_classes2)
    assert jnp.allclose(out2, ref2, rtol=1e-4, atol=1e-5), (out2, ref2)

    print("KERNEL_OK")
</pallas_src>

<mosaic_0001>
module attributes {stable_mosaic.version = 11 : i64} {
  func.func @_dice_kernel(%arg0: i32, %arg1: i32, %arg2: memref<4x256xf32, #tpu.memory_space<vmem>>, %arg3: memref<4x256xf32, #tpu.memory_space<vmem>>, %arg4: memref<4x128xf32, #tpu.memory_space<vmem>>, %arg5: memref<4x128xf32, #tpu.memory_space<vmem>>, %arg6: memref<4x128xf32, #tpu.memory_space<vmem>>, %arg7: memref<4x128xf32, #tpu.memory_space<vmem>>) attributes {dimension_semantics = [#tpu.dimension_semantics<parallel>, #tpu.dimension_semantics<arbitrary>], iteration_bounds = array<i64: 1, 1>, scalar_prefetch = 0 : i64, scratch_operands = 3 : i64, tpu.core_type = #tpu.core_type<tc>, window_params = [{transform_indices = @transform_0, window_bounds = array<i64: 4, 256>}, {transform_indices = @transform_1, window_bounds = array<i64: 4, 256>}, {transform_indices = @transform_2, window_bounds = array<i64: 4, 128>}]} {
    %c0_i32 = arith.constant 0 : i32
    %0 = arith.cmpi eq, %arg1, %c0_i32 : i32
    %1 = arith.extui %0 : i1 to i32
    %c0_i32_0 = arith.constant 0 : i32
    %2 = arith.cmpi ne, %1, %c0_i32_0 : i32
    scf.if %2 {
      %cst = arith.constant 0.000000e+00 : f32
      %30 = vector.broadcast %cst : f32 to vector<4x128xf32>
      %c0_33 = arith.constant 0 : index
      %c0_34 = arith.constant 0 : index
      %31 = vector.load %arg5[%c0_33, %c0_34] : memref<4x128xf32, #tpu.memory_space<vmem>>, vector<4x128xf32>
      tpu.vector_store %arg5[%c0_33, %c0_34], %30 {strides = array<i32>} : memref<4x128xf32, #tpu.memory_space<vmem>>, vector<4x128xf32>,
      %cst_35 = arith.constant 0.000000e+00 : f32
      %32 = vector.broadcast %cst_35 : f32 to vector<4x128xf32>
      %c0_36 = arith.constant 0 : index
      %c0_37 = arith.constant 0 : index
      %33 = vector.load %arg6[%c0_36, %c0_37] : memref<4x128xf32, #tpu.memory_space<vmem>>, vector<4x128xf32>
      tpu.vector_store %arg6[%c0_36, %c0_37], %32 {strides = array<i32>} : memref<4x128xf32, #tpu.memory_space<vmem>>, vector<4x128xf32>,
      %cst_38 = arith.constant 0.000000e+00 : f32
      %34 = vector.broadcast %cst_38 : f32 to vector<4x128xf32>
      %c0_39 = arith.constant 0 : index
      %c0_40 = arith.constant 0 : index
      %35 = vector.load %arg7[%c0_39, %c0_40] : memref<4x128xf32, #tpu.memory_space<vmem>>, vector<4x128xf32>
      tpu.vector_store %arg7[%c0_39, %c0_40], %34 {strides = array<i32>} : memref<4x128xf32, #tpu.memory_space<vmem>>, vector<4x128xf32>,
    } else {
    }
    %c0 = arith.constant 0 : index
    %c0_1 = arith.constant 0 : index
    %3 = vector.load %arg2[%c0, %c0_1] : memref<4x256xf32, #tpu.memory_space<vmem>>, vector<4x128xf32>
    %c0_2 = arith.constant 0 : index
    %c0_3 = arith.constant 0 : index
    %4 = vector.load %arg3[%c0_2, %c0_3] : memref<4x256xf32, #tpu.memory_space<vmem>>, vector<4x128xf32>
    %c0_4 = arith.constant 0 : index
    %c0_5 = arith.constant 0 : index
    %5 = vector.load %arg5[%c0_4, %c0_5] : memref<4x128xf32, #tpu.memory_space<vmem>>, vector<4x128xf32>
    %6 = arith.mulf %3, %4 : vector<4x128xf32>
    %7 = arith.addf %5, %6 : vector<4x128xf32>
    %c0_6 = arith.constant 0 : index
    %c0_7 = arith.constant 0 : index
    %8 = vector.load %arg5[%c0_6, %c0_7] : memref<4x128xf32, #tpu.memory_space<vmem>>, vector<4x128xf32>
    tpu.vector_store %arg5[%c0_6, %c0_7], %7 {strides = array<i32>} : memref<4x128xf32, #tpu.memory_space<vmem>>, vector<4x128xf32>,
    %c0_8 = arith.constant 0 : index
    %c0_9 = arith.constant 0 : index
    %9 = vector.load %arg6[%c0_8, %c0_9] : memref<4x128xf32, #tpu.memory_space<vmem>>, vector<4x128xf32>
    %10 = arith.addf %9, %3 : vector<4x128xf32>
    %c0_10 = arith.constant 0 : index
    %c0_11 = arith.constant 0 : index
    %11 = vector.load %arg6[%c0_10, %c0_11] : memref<4x128xf32, #tpu.memory_space<vmem>>, vector<4x128xf32>
    tpu.vector_store %arg6[%c0_10, %c0_11], %10 {strides = array<i32>} : memref<4x128xf32, #tpu.memory_space<vmem>>, vector<4x128xf32>,
    %c0_12 = arith.constant 0 : index
    %c0_13 = arith.constant 0 : index
    %12 = vector.load %arg7[%c0_12, %c0_13] : memref<4x128xf32, #tpu.memory_space<vmem>>, vector<4x128xf32>
    %13 = arith.addf %12, %4 : vector<4x128xf32>
    %c0_14 = arith.constant 0 : index
    %c0_15 = arith.constant 0 : index
    %14 = vector.load %arg7[%c0_14, %c0_15] : memref<4x128xf32, #tpu.memory_space<vmem>>, vector<4x128xf32>
    tpu.vector_store %arg7[%c0_14, %c0_15], %13 {strides = array<i32>} : memref<4x128xf32, #tpu.memory_space<vmem>>, vector<4x128xf32>,
    %c0_16 = arith.constant 0 : index
    %c128 = arith.constant 128 : index
    %15 = vector.load %arg2[%c0_16, %c128] : memref<4x256xf32, #tpu.memory_space<vmem>>, vector<4x128xf32>
    %c0_17 = arith.constant 0 : index
    %c128_18 = arith.constant 128 : index
    %16 = vector.load %arg3[%c0_17, %c128_18] : memref<4x256xf32, #tpu.memory_space<vmem>>, vector<4x128xf32>
    %c0_19 = arith.constant 0 : index
    %c0_20 = arith.constant 0 : index
    %17 = vector.load %arg5[%c0_19, %c0_20] : memref<4x128xf32, #tpu.memory_space<vmem>>, vector<4x128xf32>
    %18 = arith.mulf %15, %16 : vector<4x128xf32>
    %19 = arith.addf %17, %18 : vector<4x128xf32>
    %c0_21 = arith.constant 0 : index
    %c0_22 = arith.constant 0 : index
    %20 = vector.load %arg5[%c0_21, %c0_22] : memref<4x128xf32, #tpu.memory_space<vmem>>, vector<4x128xf32>
    tpu.vector_store %arg5[%c0_21, %c0_22], %19 {strides = array<i32>} : memref<4x128xf32, #tpu.memory_space<vmem>>, vector<4x128xf32>,
    %c0_23 = arith.constant 0 : index
    %c0_24 = arith.constant 0 : index
    %21 = vector.load %arg6[%c0_23, %c0_24] : memref<4x128xf32, #tpu.memory_space<vmem>>, vector<4x128xf32>
    %22 = arith.addf %21, %15 : vector<4x128xf32>
    %c0_25 = arith.constant 0 : index
    %c0_26 = arith.constant 0 : index
    %23 = vector.load %arg6[%c0_25, %c0_26] : memref<4x128xf32, #tpu.memory_space<vmem>>, vector<4x128xf32>
    tpu.vector_store %arg6[%c0_25, %c0_26], %22 {strides = array<i32>} : memref<4x128xf32, #tpu.memory_space<vmem>>, vector<4x128xf32>,
    %c0_27 = arith.constant 0 : index
    %c0_28 = arith.constant 0 : index
    %24 = vector.load %arg7[%c0_27, %c0_28] : memref<4x128xf32, #tpu.memory_space<vmem>>, vector<4x128xf32>
    %25 = arith.addf %24, %16 : vector<4x128xf32>
    %c0_29 = arith.constant 0 : index
    %c0_30 = arith.constant 0 : index
    %26 = vector.load %arg7[%c0_29, %c0_30] : memref<4x128xf32, #tpu.memory_space<vmem>>, vector<4x128xf32>
    tpu.vector_store %arg7[%c0_29, %c0_30], %25 {strides = array<i32>} : memref<4x128xf32, #tpu.memory_space<vmem>>, vector<4x128xf32>,
    %c0_i32_31 = arith.constant 0 : i32
    %27 = arith.cmpi eq, %arg1, %c0_i32_31 : i32
    %28 = arith.extui %27 : i1 to i32
    %c0_i32_32 = arith.constant 0 : i32
    %29 = arith.cmpi ne, %28, %c0_i32_32 : i32
    scf.if %29 {
      %c0_33 = arith.constant 0 : index
      %c0_34 = arith.constant 0 : index
      %30 = vector.load %arg5[%c0_33, %c0_34] : memref<4x128xf32, #tpu.memory_space<vmem>>, vector<4x128xf32>
      %cst = arith.constant dense<0.000000e+00> : vector<4xf32>
      %31 = vector.multi_reduction <add>, %30, %cst [1] : vector<4x128xf32> to vector<4xf32>
      %32 = vector.shape_cast %31 : vector<4xf32> to vector<4x1xf32>
      %c0_35 = arith.constant 0 : index
      %c0_36 = arith.constant 0 : index
      %33 = vector.load %arg6[%c0_35, %c0_36] : memref<4x128xf32, #tpu.memory_space<vmem>>, vector<4x128xf32>
      %cst_37 = arith.constant dense<0.000000e+00> : vector<4xf32>
      %34 = vector.multi_reduction <add>, %33, %cst_37 [1] : vector<4x128xf32> to vector<4xf32>
      %35 = vector.shape_cast %34 : vector<4xf32> to vector<4x1xf32>
      %c0_38 = arith.constant 0 : index
      %c0_39 = arith.constant 0 : index
      %36 = vector.load %arg7[%c0_38, %c0_39] : memref<4x128xf32, #tpu.memory_space<vmem>>, vector<4x128xf32>
      %cst_40 = arith.constant dense<0.000000e+00> : vector<4xf32>
      %37 = vector.multi_reduction <add>, %36, %cst_40 [1] : vector<4x128xf32> to vector<4xf32>
      %38 = vector.shape_cast %37 : vector<4xf32> to vector<4x1xf32>
      %cst_41 = arith.constant 2.000000e+00 : f32
      %39 = vector.broadcast %cst_41 : f32 to vector<4x1xf32>
      %40 = arith.mulf %39, %32 : vector<4x1xf32>
      %cst_42 = arith.constant 1.000000e+00 : f32
      %41 = vector.broadcast %cst_42 : f32 to vector<4x1xf32>
      %42 = arith.addf %40, %41 : vector<4x1xf32>
      %43 = arith.addf %35, %38 : vector<4x1xf32>
      %cst_43 = arith.constant 1.000000e+00 : f32
      %44 = vector.broadcast %cst_43 : f32 to vector<4x1xf32>
      %45 = arith.addf %43, %44 : vector<4x1xf32>
      %46 = arith.divf %42, %45 : vector<4x1xf32>
      %47 = vector.shape_cast %46 : vector<4x1xf32> to vector<4x1xf32>
      %48 = vector.broadcast %47 : vector<4x1xf32> to vector<4x128xf32>
      %c0_44 = arith.constant 0 : index
      %c0_45 = arith.constant 0 : index
      %49 = vector.load %arg4[%c0_44, %c0_45] : memref<4x128xf32, #tpu.memory_space<vmem>>, vector<4x128xf32>
      tpu.vector_store %arg4[%c0_44, %c0_45], %48 {strides = array<i32>} : memref<4x128xf32, #tpu.memory_space<vmem>>, vector<4x128xf32>,
    } else {
    }
    return
  }
  func.func @transform_0(%arg0: i32, %arg1: i32) -> (i32, i32) {
    %c0_i32 = arith.constant 0 : i32
    return %arg0, %arg1 : i32, i32
  }
  func.func @transform_1(%arg0: i32, %arg1: i32) -> (i32, i32) {
    %c0_i32 = arith.constant 0 : i32
    return %arg0, %arg1 : i32, i32
  }
  func.func @transform_2(%arg0: i32, %arg1: i32) -> (i32, i32) {
    %c0_i32 = arith.constant 0 : i32
    %c0_i32_0 = arith.constant 0 : i32
    return %arg0, %c0_i32 : i32, i32
  }
}

</mosaic_0001>

<bundles_post_ra>
// kernel: custom_dice.1
= control target key start
LH: loop header
LB: loop body
LE: loop exit
PB: predicated region body
PF: predicated region fallthrough
CT: control target
= control target key end

     0   :  { %v72_v0 = vmov 0.0   ;;  %vm46_vm0 = vcmask 1043456   ;;  %s103_s0 = inlined_call_operand.vmem [shape: f32[4,256], index: 0, kind: input, shape index: {}]   ;;  %s104_s1 = inlined_call_operand.vmem [shape: f32[4,256], index: 1, kind: input, shape index: {}]   ;;  %s105_s2 = inlined_call_operand.vmem [shape: f32[4,128], index: 2, kind: output, shape index: {}]  }
   0x1   :  { %16 = vst [vmem:[#allocation3] sm:$0xf] %v72_v0  ;;  %15 = vst [vmem:[#allocation2] sm:$0xf] %v72_v0  ;;  %v18_v1 = vld [vmem:[%s103_s0] sm:$0xf] }
   0x2   :  { %17 = vst [vmem:[#allocation4] sm:$0xf] %v72_v0  ;;  %v19_v2 = vld [vmem:[%s104_s1] sm:$0xf]  ;;  %v30_v10 = vld [vmem:[%s103_s0 + $0x4] sm:$0xf] }
   0x3   :  { %v21_v3 = vmul.f32 %v19_v2, %v18_v1  ;;  %v31_v11 = vld [vmem:[%s104_s1 + $0x4] sm:$0xf] }
   0x4   :  { %v33_v12 = vmul.f32 %v31_v11, %v30_v10 }
   0x8   :  { %v24_v4 = vld [vmem:[#allocation3] sm:$0xf]  ;;  %v20_v6 = vld [vmem:[#allocation2] sm:$0xf] }
   0x9   :  { %v27_v5 = vld [vmem:[#allocation4] sm:$0xf]  ;;  %v25_v7 = vadd.f32 %v24_v4, %v18_v1  ;;  %v22_v9 = vadd.f32 %v21_v3, %v20_v6 }
   0xa   :  { %v28_v8 = vadd.f32 %v27_v5, %v19_v2 }
   0xb   :  { %26 = vst [vmem:[#allocation3] sm:$0xf] %v25_v7  ;;  %23 = vst [vmem:[#allocation2] sm:$0xf] %v22_v9 }
   0xc   :  { %29 = vst [vmem:[#allocation4] sm:$0xf] %v28_v8 }
  0x12   :  { %v36_v13 = vld [vmem:[#allocation3] sm:$0xf]  ;;  %v32_v15 = vld [vmem:[#allocation2] sm:$0xf] }
  0x13   :  { %v39_v14 = vld [vmem:[#allocation4] sm:$0xf]  ;;  %v37_v16 = vadd.f32 %v36_v13, %v30_v10  ;;  %v34_v18 = vadd.f32 %v33_v12, %v32_v15 }
  0x14   :  { %v40_v17 = vadd.f32 %v39_v14, %v31_v11 }
  0x15   :  { %38 = vst [vmem:[#allocation3] sm:$0xf] %v37_v16  ;;  %35 = vst [vmem:[#allocation2] sm:$0xf] %v34_v18 }
  0x16   :  { %41 = vst [vmem:[#allocation4] sm:$0xf] %v40_v17 }
  0x1c   :  { %v50_v19 = vld [vmem:[#allocation3] sm:$0xf]  ;;  %v45_v21 = vld [vmem:[#allocation2] sm:$0xf] }
  0x1d   :  { %v54_v20 = vld [vmem:[#allocation4] sm:$0xf]  ;;  %v51_v22 = vsel %vm46_vm0, %v50_v19, 0.0  ;;  %v47_v23 = vsel %vm46_vm0, %v45_v21, 0.0 }
  0x1e   :  { %52 = vadd.xlane.f32.xlu0 %v51_v22  ;;  %48 = vadd.xlane.f32.xlu1 %v47_v23  ;;  %v55_v24 = vsel %vm46_vm0, %v54_v20, 0.0 }
  0x22   :  { %56 = vadd.xlane.f32.xlu0 %v55_v24 }
  0xab   :  { %v53_v25 = vpop.xlane.xlu0 %52  ;;  %v49_v29 = vpop.xlane.xlu1 %48 }
  0xac   :  { %v58_v30 = vmul.f32 2.0, %v49_v29 }
  0xae   :  { %v59_v31 = vadd.f32 1.0, %v58_v30 }
  0xaf   :  { %v57_v26 = vpop.xlane.xlu0 %56 }
  0xb0   :  { %v60_v27 = vadd.f32 %v57_v26, %v53_v25 }
  0xb2   :  { %v61_v28 = vadd.f32 1.0, %v60_v27 }
  0xb4   :  { %70 = vrcp.f32 %v61_v28 }
  0xbe   :  { %v71_v32 = vpop.eup %70 }
  0xbf   :  { %v63_v33 = vmul.f32 %v71_v32, %v59_v31 }
  0xc1   :  { %64 = vst [vmem:[%s105_s2] sm:$0xf] %v63_v33 }

</bundles_post_ra>
